<compile_context>
chip_gen: v7x
topology: tpu7x:2x2x1
jax: 0.10.0
libtpu: 0.0.40
codegen_flags: <defaults>
</compile_context>

<pallas_src>
from functools import partial

import jax
import jax.numpy as jnp
from jax.experimental import pallas as pl
from jax.experimental.pallas import tpu as pltpu


# ----------------------------------------------------------------------------
# Helpers.
# ----------------------------------------------------------------------------
def _round_up(x, m):
    return (x + m - 1) // m * m


def _pick_row_tile(m, cap=512):
    """Largest divisor of m that is <= cap, preferring multiples of 8."""
    cap = min(m, cap)
    start = cap - (cap % 8)
    for d in range(start, 0, -8):
        if d > 0 and m % d == 0:
            return d
    for d in range(cap, 0, -1):
        if m % d == 0:
            return d
    return m


def _prep_gate_weight(w, H, Gp, dtype):
    """PyTorch (4H, K) weight -> (K, Gp): gates packed [i|f|g|o], tail zeros."""
    wt = jnp.transpose(w).astype(jnp.float32)          # (K, 4H)
    wt = jnp.pad(wt, ((0, 0), (0, Gp - 4 * H)))
    return wt.astype(dtype)


def _prep_gate_bias(b_ih, b_hh, H, Gp):
    b = (b_ih + b_hh).astype(jnp.float32)
    b = jnp.pad(b, (0, Gp - 4 * H))
    return b.reshape(1, Gp)


# ----------------------------------------------------------------------------
# GEMM + bias kernel: o = x @ w + b.  Used only for the final Linear layer.
# Row-tiled, "parallel" grid, f32 accumulation.
# ----------------------------------------------------------------------------
def _matmul_bias_kernel(x_ref, w_ref, b_ref, o_ref):
    o_ref[...] = (jnp.dot(x_ref[...], w_ref[...],
                          preferred_element_type=jnp.float32)
                  + b_ref[...]).astype(o_ref.dtype)


def matmul_bias(x2d, w, b2, out_dtype=jnp.float32):
    """x2d: (M, K), w: (K, N), b2: (1, N) f32 -> (M, N) out_dtype."""
    M, K = x2d.shape
    K2, N = w.shape
    assert K == K2
    tm = _pick_row_tile(M, cap=512)
    # TODO(synk): for very large N (>~2048) add a second grid axis tiling N so
    # the resident (K, N) weight stays inside v7x's 64 MiB VMEM.
    kl, nl = _round_up(K, 128), _round_up(N, 128)
    fp = (2 * tm * kl * x2d.dtype.itemsize + 2 * tm * nl * 4
          + kl * nl * w.dtype.itemsize + nl * 4)
    vmem_limit = int(max(32 << 20, min(64 << 20, 2 * fp)))
    return pl.pallas_call(
        _matmul_bias_kernel,
        out_shape=jax.ShapeDtypeStruct((M, N), out_dtype),
        grid_spec=pltpu.PrefetchScalarGridSpec(
            num_scalar_prefetch=0,
            grid=(M // tm,),
            in_specs=[
                pl.BlockSpec((tm, K), lambda i: (i, 0)),
                pl.BlockSpec((K, N), lambda i: (0, 0)),
                pl.BlockSpec((1, N), lambda i: (0, 0)),
            ],
            out_specs=pl.BlockSpec((tm, N), lambda i: (i, 0)),
        ),
        compiler_params=pltpu.CompilerParams(
            dimension_semantics=("parallel",),
            vmem_limit_bytes=vmem_limit),
    )(x2d, w, b2)


# ----------------------------------------------------------------------------
# Fused LSTM layer kernel.  One grid step = (one batch tile, Tc timesteps).
#   1) xg = x_chunk @ W_ih + bias   -- one MXU GEMM for the whole chunk
#   2) sequential recurrence: gates = xg[t] + h @ W_hh, gate math in f32
# Gate order matches PyTorch: [i, f, g, o], packed contiguously (width H each).
# ----------------------------------------------------------------------------
def _lstm_layer_kernel(x_ref, wih_ref, whh_ref, b_ref,
                       out_ref, hn_ref, cn_ref,
                       xg_sc, h_sc, c_sc,
                       *, hdim, tc, t_valid, ragged, unroll):
    t_idx = pl.program_id(1)                # time axis (innermost, "arbitrary")

    @pl.when(t_idx == 0)
    def _init():
        h_sc[...] = jnp.zeros_like(h_sc)
        c_sc[...] = jnp.zeros_like(c_sc)

    # ---- fused input projection for the whole Tc-chunk (one MXU GEMM) ------
    tcb, bt, k = x_ref.shape
    x2 = x_ref[...].reshape(tcb * bt, k)
    xg = jnp.dot(x2, wih_ref[...], preferred_element_type=jnp.float32)
    xg = xg + b_ref[...]                    # (tc*bt, Gp) + (1, Gp), f32
    xg_sc[...] = xg.reshape(tcb, bt, -1)

    w_hh = whh_ref[...]                     # resident recurrent weight
    base = t_idx * tc                       # first global timestep of chunk

    def step(i, carry):
        h, c = carry
        g = xg_sc[i] + jnp.dot(h.astype(w_hh.dtype), w_hh,
                               preferred_element_type=jnp.float32)
        i_g = jax.nn.sigmoid(g[:, 0 * hdim:1 * hdim])
        f_g = jax.nn.sigmoid(g[:, 1 * hdim:2 * hdim])
        g_g = jnp.tanh(g[:, 2 * hdim:3 * hdim])
        o_g = jax.nn.sigmoid(g[:, 3 * hdim:4 * hdim])
        c_new = f_g * c + i_g * g_g
        h_new = o_g * jnp.tanh(c_new)
        out_ref[i] = h_new.astype(out_ref.dtype)
        if ragged:                          # only emitted when Tp != T
            valid = (base + i) < t_valid
            h_new = jnp.where(valid, h_new, h)
            c_new = jnp.where(valid, c_new, c)
        return (h_new, c_new)

    h, c = jax.lax.fori_loop(0, tc, step, (h_sc[...], c_sc[...]),
                             unroll=unroll)
    h_sc[...] = h
    c_sc[...] = c
    # Constant output index along the time axis -> resident block; only the
    # last time step's value reaches HBM (per batch tile).
    hn_ref[...] = h
    cn_ref[...] = c


def lstm_layer(x, wih_t, whh_t, bias2, *, hdim, gp, tc, bt, t_valid,
               out_dtype, vmem_limit):
    """x: (Tp, Bp, K) compute_dtype.  Returns (h_seq (Tp,Bp,H) out_dtype,
    h_n (Bp,H) f32, c_n (Bp,H) f32)."""
    Tp, Bp, K = x.shape
    n_b, n_t = Bp // bt, Tp // tc
    ragged = (t_valid != Tp)
    unroll = max(1, min(tc, 8 if gp <= 2048 else 4))
    kernel = partial(_lstm_layer_kernel, hdim=hdim, tc=tc, t_valid=t_valid,
                     ragged=ragged, unroll=unroll)
    return pl.pallas_call(
        kernel,
        out_shape=(
            jax.ShapeDtypeStruct((Tp, Bp, hdim), out_dtype),
            jax.ShapeDtypeStruct((Bp, hdim), jnp.float32),
            jax.ShapeDtypeStruct((Bp, hdim), jnp.float32),
        ),
        grid_spec=pltpu.PrefetchScalarGridSpec(
            num_scalar_prefetch=0,
            grid=(n_b, n_t),                               # batch tiles, time
            in_specs=[
                pl.BlockSpec((tc, bt, K), lambda b, t: (t, b, 0)),   # x chunk
                pl.BlockSpec((K, gp), lambda b, t: (0, 0)),          # W_ih
                pl.BlockSpec((hdim, gp), lambda b, t: (0, 0)),       # W_hh
                pl.BlockSpec((1, gp), lambda b, t: (0, 0)),          # bias
            ],
            out_specs=[
                pl.BlockSpec((tc, bt, hdim), lambda b, t: (t, b, 0)),
                pl.BlockSpec((bt, hdim), lambda b, t: (b, 0)),       # h_n
                pl.BlockSpec((bt, hdim), lambda b, t: (b, 0)),       # c_n
            ],
            scratch_shapes=[
                pltpu.VMEM((tc, bt, gp), jnp.float32),     # chunk gate slab
                pltpu.VMEM((bt, hdim), jnp.float32),       # h state
                pltpu.VMEM((bt, hdim), jnp.float32),       # c state
            ],
        ),
        compiler_params=pltpu.CompilerParams(
            dimension_semantics=("parallel", "arbitrary"),
            vmem_limit_bytes=vmem_limit),
    )(x, wih_t, whh_t, bias2)


# ----------------------------------------------------------------------------
# Full LSTMmodel.forward equivalent.
# ----------------------------------------------------------------------------
def lstm_model_forward(seq_btf, params, hidden_size,
                       compute_dtype=jnp.bfloat16, batch_tile=None):
    """seq_btf: (B, T, input_size) float32 (batch_first, like PyTorch).

    compute_dtype is the MXU/activation-storage dtype (bf16 default, f32
    opt-in); accumulation, gate math and h/c state are always float32.
    Returns (pred (B,T,out_size), (h_n, c_n)) with h_n/c_n of shape
    (num_layers, B, hidden_size)."""
    B, T, F = seq_btf.shape
    H = hidden_size
    Gp = _round_up(4 * H, 128)              # packed gate slab, lane aligned
    Bp = _round_up(max(B, 1), 8)            # sublane-aligned batch
    if batch_tile is not None:
        bt = batch_tile
        Bp = _round_up(Bp, bt)
    elif Bp >= 16:                          # give v7x's 2nd TensorCore work
        Bp = _round_up(Bp, 16)
        bt = Bp // 2
    else:
        bt = Bp

    # Time chunk sized against a conservative VMEM budget (v7x: 64 MiB total).
    ib = jnp.dtype(compute_dtype).itemsize
    kl = _round_up(max(F, H), 128)
    hl = _round_up(H, 128)

    def footprint(tc_):
        return (2 * tc_ * bt * kl * ib          # x double buffer
                + 2 * tc_ * bt * hl * ib        # h-seq out double buffer
                + tc_ * bt * Gp * 4             # gate-slab scratch
                + 2 * (kl + hl) * Gp * ib       # resident weights
                + Gp * 4 + 4 * bt * hl * 4)     # bias, h/c scratch, h_n/c_n

    tc = min(T, 32)
    while tc > 1 and footprint(tc) > (24 << 20):
        tc = max(1, tc // 2)
    Tp = _round_up(T, tc)                   # ragged tail handled in-kernel
    vmem_limit = int(max(32 << 20, min(64 << 20, 2 * footprint(tc))))

    x = jnp.transpose(seq_btf, (1, 0, 2)).astype(compute_dtype)   # (T, B, F)
    x = jnp.pad(x, ((0, Tp - T), (0, Bp - B), (0, 0)))            # (Tp, Bp, F)

    h_list, c_list = [], []
    for layer in params["lstm"]:
        wih_t = _prep_gate_weight(layer["w_ih"], H, Gp, compute_dtype)  # (K,Gp)
        whh_t = _prep_gate_weight(layer["w_hh"], H, Gp, compute_dtype)  # (H,Gp)
        bias2 = _prep_gate_bias(layer["b_ih"], layer["b_hh"], H, Gp)    # f32
        x, h_n, c_n = lstm_layer(x, wih_t, whh_t, bias2, hdim=H, gp=Gp,
                                 tc=tc, bt=bt, t_valid=T,
                                 out_dtype=compute_dtype,
                                 vmem_limit=vmem_limit)
        h_list.append(h_n[:B])
        c_list.append(c_n[:B])

    # Final Linear on the flattened activation slab (lane-padded output).
    O = params["linear"]["w"].shape[0]
    Op = _round_up(O, 128)
    wlin = jnp.pad(jnp.transpose(params["linear"]["w"]).astype(jnp.float32),
                   ((0, 0), (0, Op - O))).astype(compute_dtype)   # (H, Op)
    blin = jnp.pad(params["linear"]["b"].astype(jnp.float32),
                   (0, Op - O)).reshape(1, Op)
    pred = matmul_bias(x.reshape(Tp * Bp, H), wlin, blin,
                       out_dtype=jnp.float32)
    pred = pred.reshape(Tp, Bp, Op)[:T, :B, :O]                   # (T, B, O)
    pred = jnp.transpose(pred, (1, 0, 2))                         # (B, T, O)

    return pred, (jnp.stack(h_list, 0), jnp.stack(c_list, 0))


# ----------------------------------------------------------------------------
# Pure-JAX reference (lax.scan) for correctness checking.
# ----------------------------------------------------------------------------
def _ref_forward(seq_btf, params, hidden_size):
    B, T, _ = seq_btf.shape
    x = jnp.transpose(seq_btf, (1, 0, 2)).astype(jnp.float32)   # (T, B, F)
    H = hidden_size
    h_list, c_list = [], []
    for layer in params["lstm"]:
        w_ih, w_hh = layer["w_ih"], layer["w_hh"]
        b = layer["b_ih"] + layer["b_hh"]

        def step(carry, x_t, w_ih=w_ih, w_hh=w_hh, b=b):
            h, c = carry
            gates = x_t @ w_ih.T + h @ w_hh.T + b
            i = jax.nn.sigmoid(gates[:, 0 * H:1 * H])
            f = jax.nn.sigmoid(gates[:, 1 * H:2 * H])
            g = jnp.tanh(gates[:, 2 * H:3 * H])
            o = jax.nn.sigmoid(gates[:, 3 * H:4 * H])
            c_new = f * c + i * g
            h_new = o * jnp.tanh(c_new)
            return (h_new, c_new), h_new

        init = (jnp.zeros((B, H), jnp.float32), jnp.zeros((B, H), jnp.float32))
        (h_n, c_n), ys = jax.lax.scan(step, init, x)
        x = ys
        h_list.append(h_n)
        c_list.append(c_n)
    lstm_out = jnp.transpose(x, (1, 0, 2))
    pred = lstm_out @ params["linear"]["w"].T + params["linear"]["b"]
    return pred, (jnp.stack(h_list, 0), jnp.stack(c_list, 0))


def init_params(key, input_size, hidden_size, out_size, layers):
    """Uniform init mirroring PyTorch's U(-1/sqrt(H), 1/sqrt(H))."""
    k = 1.0 / jnp.sqrt(jnp.float32(hidden_size))
    params = {"lstm": []}
    for l in range(layers):
        in_dim = input_size if l == 0 else hidden_size
        key, k1, k2, k3, k4 = jax.random.split(key, 5)
        params["lstm"].append({
            "w_ih": jax.random.uniform(k1, (4 * hidden_size, in_dim),
                                       jnp.float32, -k, k),
            "w_hh": jax.random.uniform(k2, (4 * hidden_size, hidden_size),
                                       jnp.float32, -k, k),
            "b_ih": jax.random.uniform(k3, (4 * hidden_size,),
                                       jnp.float32, -k, k),
            "b_hh": jax.random.uniform(k4, (4 * hidden_size,),
                                       jnp.float32, -k, k),
        })
    key, k1, k2 = jax.random.split(key, 3)
    params["linear"] = {
        "w": jax.random.uniform(k1, (out_size, hidden_size), jnp.float32, -k, k),
        "b": jax.random.uniform(k2, (out_size,), jnp.float32, -k, k),
    }
    return params


if __name__ == "__main__":
    # Small shapes consistent with the module: seq (B, T, input_size).
    B, T = 2, 8
    input_size, hidden_size, out_size, layers = 4, 32, 4, 2

    key = jax.random.PRNGKey(0)
    key, pkey, xkey = jax.random.split(key, 3)
    params = init_params(pkey, input_size, hidden_size, out_size, layers)
    seq = jax.random.normal(xkey, (B, T, input_size), jnp.float32)

    pred_ref, (h_ref, c_ref) = _ref_forward(seq, params, hidden_size)

    # ---- f32 opt-in path: tight check ---------------------------------------
    pred, (h_n, c_n) = lstm_model_forward(seq, params, hidden_size,
                                          compute_dtype=jnp.float32)
    pred = jax.block_until_ready(pred)
    h_n = jax.block_until_ready(h_n)
    c_n = jax.block_until_ready(c_n)

    assert pred.shape == (B, T, out_size)
    assert h_n.shape == (layers, B, hidden_size)
    assert c_n.shape == (layers, B, hidden_size)
    assert jnp.allclose(pred, pred_ref, atol=1e-5, rtol=1e-5)
    assert jnp.allclose(h_n, h_ref, atol=1e-5, rtol=1e-5)
    assert jnp.allclose(c_n, c_ref, atol=1e-5, rtol=1e-5)

    # ---- default bf16 path (f32 accumulation / gate math): loose check ------
    pred_bf, (h_bf, c_bf) = lstm_model_forward(seq, params, hidden_size)
    pred_bf = jax.block_until_ready(pred_bf)
    h_bf = jax.block_until_ready(h_bf)
    c_bf = jax.block_until_ready(c_bf)
    assert pred_bf.shape == (B, T, out_size)
    assert h_bf.shape == (layers, B, hidden_size)
    assert jnp.allclose(pred_bf, pred_ref, atol=1e-1, rtol=1e-1)
    assert jnp.allclose(h_bf, h_ref, atol=1e-1, rtol=1e-1)

    print("KERNEL_OK")
</pallas_src>

<mosaic_0001>
module attributes {stable_mosaic.version = 11 : i64} {
  func.func @_lstm_layer_kernel(%arg0: i32, %arg1: i32, %arg2: memref<8x8x4xf32, #tpu.memory_space<vmem>>, %arg3: memref<4x128xf32, #tpu.memory_space<vmem>>, %arg4: memref<32x128xf32, #tpu.memory_space<vmem>>, %arg5: memref<1x128xf32, #tpu.memory_space<vmem>>, %arg6: memref<8x8x32xf32, #tpu.memory_space<vmem>>, %arg7: memref<8x32xf32, #tpu.memory_space<vmem>>, %arg8: memref<8x32xf32, #tpu.memory_space<vmem>>, %arg9: memref<8x8x128xf32, #tpu.memory_space<vmem>>, %arg10: memref<8x32xf32, #tpu.memory_space<vmem>>, %arg11: memref<8x32xf32, #tpu.memory_space<vmem>>) attributes {dimension_semantics = [#tpu.dimension_semantics<parallel>, #tpu.dimension_semantics<arbitrary>], iteration_bounds = array<i64: 1, 1>, scalar_prefetch = 0 : i64, scratch_operands = 3 : i64, tpu.core_type = #tpu.core_type<tc>, window_params = [{transform_indices = @transform_0, window_bounds = array<i64: 8, 8, 4>}, {pipeline_mode = #tpu.pipeline_mode<synchronous>, transform_indices = @transform_1, window_bounds = array<i64: 4, 128>}, {pipeline_mode = #tpu.pipeline_mode<synchronous>, transform_indices = @transform_2, window_bounds = array<i64: 32, 128>}, {pipeline_mode = #tpu.pipeline_mode<synchronous>, transform_indices = @transform_3, window_bounds = array<i64: 1, 128>}, {transform_indices = @transform_4, window_bounds = array<i64: 8, 8, 32>}, {transform_indices = @transform_5, window_bounds = array<i64: 8, 32>}, {transform_indices = @transform_6, window_bounds = array<i64: 8, 32>}]} {
    %c0_i32 = arith.constant 0 : i32
    %0 = arith.cmpi eq, %arg1, %c0_i32 : i32
    %1 = arith.extui %0 : i1 to i32
    %c0_i32_0 = arith.constant 0 : i32
    %2 = arith.cmpi ne, %1, %c0_i32_0 : i32
    scf.if %2 {
      %cst_89 = arith.constant 0.000000e+00 : f32
      %291 = vector.broadcast %cst_89 : f32 to vector<8x32xf32>
      %c0_90 = arith.constant 0 : index
      %c0_91 = arith.constant 0 : index
      %292 = vector.load %arg10[%c0_90, %c0_91] : memref<8x32xf32, #tpu.memory_space<vmem>>, vector<8x32xf32>
      tpu.vector_store %arg10[%c0_90, %c0_91], %291 {strides = array<i32>} : memref<8x32xf32, #tpu.memory_space<vmem>>, vector<8x32xf32>,
      %cst_92 = arith.constant 0.000000e+00 : f32
      %293 = vector.broadcast %cst_92 : f32 to vector<8x32xf32>
      %c0_93 = arith.constant 0 : index
      %c0_94 = arith.constant 0 : index
      %294 = vector.load %arg11[%c0_93, %c0_94] : memref<8x32xf32, #tpu.memory_space<vmem>>, vector<8x32xf32>
      tpu.vector_store %arg11[%c0_93, %c0_94], %293 {strides = array<i32>} : memref<8x32xf32, #tpu.memory_space<vmem>>, vector<8x32xf32>,
    } else {
    }
    %c0 = arith.constant 0 : index
    %c0_1 = arith.constant 0 : index
    %c0_2 = arith.constant 0 : index
    %3 = vector.load %arg2[%c0, %c0_1, %c0_2] : memref<8x8x4xf32, #tpu.memory_space<vmem>>, vector<8x8x4xf32>
    %4 = vector.shape_cast %3 : vector<8x8x4xf32> to vector<64x4xf32>
    %c0_3 = arith.constant 0 : index
    %c0_4 = arith.constant 0 : index
    %5 = vector.load %arg3[%c0_3, %c0_4] : memref<4x128xf32, #tpu.memory_space<vmem>>, vector<4x128xf32>
    %cst = arith.constant dense<0.000000e+00> : vector<64x128xf32>
    %6 = tpu.matmul %4, %5, %cst {dimension_numbers = #tpu.dot_dimension_numbers<[1], [0], [0], [1], [0, 0, 1, 1], [], []>} : vector<64x4xf32>, vector<4x128xf32>, vector<64x128xf32> -> vector<64x128xf32>
    %c0_5 = arith.constant 0 : index
    %c0_6 = arith.constant 0 : index
    %7 = vector.load %arg5[%c0_5, %c0_6] : memref<1x128xf32, #tpu.memory_space<vmem>>, vector<1x128xf32>
    %8 = vector.broadcast %7 : vector<1x128xf32> to vector<64x128xf32>
    %9 = arith.addf %6, %8 : vector<64x128xf32>
    %10 = vector.shape_cast %9 : vector<64x128xf32> to vector<8x8x128xf32>
    %c0_7 = arith.constant 0 : index
    %c0_8 = arith.constant 0 : index
    %c0_9 = arith.constant 0 : index
    %11 = vector.load %arg9[%c0_7, %c0_8, %c0_9] : memref<8x8x128xf32, #tpu.memory_space<vmem>>, vector<8x8x128xf32>
    tpu.vector_store %arg9[%c0_7, %c0_8, %c0_9], %10 {strides = array<i32>} : memref<8x8x128xf32, #tpu.memory_space<vmem>>, vector<8x8x128xf32>,
    %c0_10 = arith.constant 0 : index
    %c0_11 = arith.constant 0 : index
    %12 = vector.load %arg4[%c0_10, %c0_11] : memref<32x128xf32, #tpu.memory_space<vmem>>, vector<32x128xf32>
    %c0_12 = arith.constant 0 : index
    %c0_13 = arith.constant 0 : index
    %13 = vector.load %arg10[%c0_12, %c0_13] : memref<8x32xf32, #tpu.memory_space<vmem>>, vector<8x32xf32>
    %c0_14 = arith.constant 0 : index
    %c0_15 = arith.constant 0 : index
    %14 = vector.load %arg11[%c0_14, %c0_15] : memref<8x32xf32, #tpu.memory_space<vmem>>, vector<8x32xf32>
    %c0_i32_16 = arith.constant 0 : i32
    %15 = arith.index_cast %c0_i32_16 : i32 to index
    %c0_17 = arith.constant 0 : index
    %c0_18 = arith.constant 0 : index
    %16 = vector.load %arg9[%15, %c0_17, %c0_18] : memref<8x8x128xf32, #tpu.memory_space<vmem>>, vector<1x8x128xf32>
    %17 = vector.shape_cast %16 : vector<1x8x128xf32> to vector<8x128xf32>
    %cst_19 = arith.constant dense<0.000000e+00> : vector<8x128xf32>
    %18 = tpu.matmul %13, %12, %cst_19 {dimension_numbers = #tpu.dot_dimension_numbers<[1], [0], [0], [1], [0, 0, 1, 1], [], []>} : vector<8x32xf32>, vector<32x128xf32>, vector<8x128xf32> -> vector<8x128xf32>
    %19 = arith.addf %17, %18 : vector<8x128xf32>
    %20 = vector.extract_strided_slice %19 {offsets = [0, 0], sizes = [8, 32], strides = [1, 1]} : vector<8x128xf32> to vector<8x32xf32>
    %21 = arith.negf %20 : vector<8x32xf32>
    %22 = math.exp %21 : vector<8x32xf32>
    %cst_20 = arith.constant 1.000000e+00 : f32
    %23 = vector.broadcast %cst_20 : f32 to vector<8x32xf32>
    %24 = arith.addf %23, %22 : vector<8x32xf32>
    %25 = arith.divf %23, %24 : vector<8x32xf32>
    %26 = vector.extract_strided_slice %19 {offsets = [0, 32], sizes = [8, 32], strides = [1, 1]} : vector<8x128xf32> to vector<8x32xf32>
    %27 = arith.negf %26 : vector<8x32xf32>
    %28 = math.exp %27 : vector<8x32xf32>
    %cst_21 = arith.constant 1.000000e+00 : f32
    %29 = vector.broadcast %cst_21 : f32 to vector<8x32xf32>
    %30 = arith.addf %29, %28 : vector<8x32xf32>
    %31 = arith.divf %29, %30 : vector<8x32xf32>
    %32 = vector.extract_strided_slice %19 {offsets = [0, 64], sizes = [8, 32], strides = [1, 1]} : vector<8x128xf32> to vector<8x32xf32>
    %33 = math.tanh %32 : vector<8x32xf32>
    %34 = vector.extract_strided_slice %19 {offsets = [0, 96], sizes = [8, 32], strides = [1, 1]} : vector<8x128xf32> to vector<8x32xf32>
    %35 = arith.negf %34 : vector<8x32xf32>
    %36 = math.exp %35 : vector<8x32xf32>
    %cst_22 = arith.constant 1.000000e+00 : f32
    %37 = vector.broadcast %cst_22 : f32 to vector<8x32xf32>
    %38 = arith.addf %37, %36 : vector<8x32xf32>
    %39 = arith.divf %37, %38 : vector<8x32xf32>
    %40 = arith.mulf %31, %14 : vector<8x32xf32>
    %41 = arith.mulf %25, %33 : vector<8x32xf32>
    %42 = arith.addf %40, %41 : vector<8x32xf32>
    %43 = math.tanh %42 : vector<8x32xf32>
    %44 = arith.mulf %39, %43 : vector<8x32xf32>
    %45 = arith.index_cast %c0_i32_16 : i32 to index
    %c0_23 = arith.constant 0 : index
    %c0_24 = arith.constant 0 : index
    %46 = vector.load %arg6[%45, %c0_23, %c0_24] : memref<8x8x32xf32, #tpu.memory_space<vmem>>, vector<1x8x32xf32>
    %47 = vector.shape_cast %46 : vector<1x8x32xf32> to vector<8x32xf32>
    %48 = vector.shape_cast %44 : vector<8x32xf32> to vector<1x8x32xf32>
    tpu.vector_store %arg6[%45, %c0_23, %c0_24], %48 {strides = array<i32>} : memref<8x8x32xf32, #tpu.memory_space<vmem>>, vector<1x8x32xf32>,
    %c1_i32 = arith.constant 1 : i32
    %49 = arith.index_cast %c1_i32 : i32 to index
    %c0_25 = arith.constant 0 : index
    %c0_26 = arith.constant 0 : index
    %50 = vector.load %arg9[%49, %c0_25, %c0_26] : memref<8x8x128xf32, #tpu.memory_space<vmem>>, vector<1x8x128xf32>
    %51 = vector.shape_cast %50 : vector<1x8x128xf32> to vector<8x128xf32>
    %cst_27 = arith.constant dense<0.000000e+00> : vector<8x128xf32>
    %52 = tpu.matmul %44, %12, %cst_27 {dimension_numbers = #tpu.dot_dimension_numbers<[1], [0], [0], [1], [0, 0, 1, 1], [], []>} : vector<8x32xf32>, vector<32x128xf32>, vector<8x128xf32> -> vector<8x128xf32>
    %53 = arith.addf %51, %52 : vector<8x128xf32>
    %54 = vector.extract_strided_slice %53 {offsets = [0, 0], sizes = [8, 32], strides = [1, 1]} : vector<8x128xf32> to vector<8x32xf32>
    %55 = arith.negf %54 : vector<8x32xf32>
    %56 = math.exp %55 : vector<8x32xf32>
    %cst_28 = arith.constant 1.000000e+00 : f32
    %57 = vector.broadcast %cst_28 : f32 to vector<8x32xf32>
    %58 = arith.addf %57, %56 : vector<8x32xf32>
    %59 = arith.divf %57, %58 : vector<8x32xf32>
    %60 = vector.extract_strided_slice %53 {offsets = [0, 32], sizes = [8, 32], strides = [1, 1]} : vector<8x128xf32> to vector<8x32xf32>
    %61 = arith.negf %60 : vector<8x32xf32>
    %62 = math.exp %61 : vector<8x32xf32>
    %cst_29 = arith.constant 1.000000e+00 : f32
    %63 = vector.broadcast %cst_29 : f32 to vector<8x32xf32>
    %64 = arith.addf %63, %62 : vector<8x32xf32>
    %65 = arith.divf %63, %64 : vector<8x32xf32>
    %66 = vector.extract_strided_slice %53 {offsets = [0, 64], sizes = [8, 32], strides = [1, 1]} : vector<8x128xf32> to vector<8x32xf32>
    %67 = math.tanh %66 : vector<8x32xf32>
    %68 = vector.extract_strided_slice %53 {offsets = [0, 96], sizes = [8, 32], strides = [1, 1]} : vector<8x128xf32> to vector<8x32xf32>
    %69 = arith.negf %68 : vector<8x32xf32>
    %70 = math.exp %69 : vector<8x32xf32>
    %cst_30 = arith.constant 1.000000e+00 : f32
    %71 = vector.broadcast %cst_30 : f32 to vector<8x32xf32>
    %72 = arith.addf %71, %70 : vector<8x32xf32>
    %73 = arith.divf %71, %72 : vector<8x32xf32>
    %74 = arith.mulf %65, %42 : vector<8x32xf32>
    %75 = arith.mulf %59, %67 : vector<8x32xf32>
    %76 = arith.addf %74, %75 : vector<8x32xf32>
    %77 = math.tanh %76 : vector<8x32xf32>
    %78 = arith.mulf %73, %77 : vector<8x32xf32>
    %79 = arith.index_cast %c1_i32 : i32 to index
    %c0_31 = arith.constant 0 : index
    %c0_32 = arith.constant 0 : index
    %80 = vector.load %arg6[%79, %c0_31, %c0_32] : memref<8x8x32xf32, #tpu.memory_space<vmem>>, vector<1x8x32xf32>
    %81 = vector.shape_cast %80 : vector<1x8x32xf32> to vector<8x32xf32>
    %82 = vector.shape_cast %78 : vector<8x32xf32> to vector<1x8x32xf32>
    tpu.vector_store %arg6[%79, %c0_31, %c0_32], %82 {strides = array<i32>} : memref<8x8x32xf32, #tpu.memory_space<vmem>>, vector<1x8x32xf32>,
    %c2_i32 = arith.constant 2 : i32
    %83 = arith.index_cast %c2_i32 : i32 to index
    %c0_33 = arith.constant 0 : index
    %c0_34 = arith.constant 0 : index
    %84 = vector.load %arg9[%83, %c0_33, %c0_34] : memref<8x8x128xf32, #tpu.memory_space<vmem>>, vector<1x8x128xf32>
    %85 = vector.shape_cast %84 : vector<1x8x128xf32> to vector<8x128xf32>
    %cst_35 = arith.constant dense<0.000000e+00> : vector<8x128xf32>
    %86 = tpu.matmul %78, %12, %cst_35 {dimension_numbers = #tpu.dot_dimension_numbers<[1], [0], [0], [1], [0, 0, 1, 1], [], []>} : vector<8x32xf32>, vector<32x128xf32>, vector<8x128xf32> -> vector<8x128xf32>
    %87 = arith.addf %85, %86 : vector<8x128xf32>
    %88 = vector.extract_strided_slice %87 {offsets = [0, 0], sizes = [8, 32], strides = [1, 1]} : vector<8x128xf32> to vector<8x32xf32>
    %89 = arith.negf %88 : vector<8x32xf32>
    %90 = math.exp %89 : vector<8x32xf32>
    %cst_36 = arith.constant 1.000000e+00 : f32
    %91 = vector.broadcast %cst_36 : f32 to vector<8x32xf32>
    %92 = arith.addf %91, %90 : vector<8x32xf32>
    %93 = arith.divf %91, %92 : vector<8x32xf32>
    %94 = vector.extract_strided_slice %87 {offsets = [0, 32], sizes = [8, 32], strides = [1, 1]} : vector<8x128xf32> to vector<8x32xf32>
    %95 = arith.negf %94 : vector<8x32xf32>
    %96 = math.exp %95 : vector<8x32xf32>
    %cst_37 = arith.constant 1.000000e+00 : f32
    %97 = vector.broadcast %cst_37 : f32 to vector<8x32xf32>
    %98 = arith.addf %97, %96 : vector<8x32xf32>
    %99 = arith.divf %97, %98 : vector<8x32xf32>
    %100 = vector.extract_strided_slice %87 {offsets = [0, 64], sizes = [8, 32], strides = [1, 1]} : vector<8x128xf32> to vector<8x32xf32>
    %101 = math.tanh %100 : vector<8x32xf32>
    %102 = vector.extract_strided_slice %87 {offsets = [0, 96], sizes = [8, 32], strides = [1, 1]} : vector<8x128xf32> to vector<8x32xf32>
    %103 = arith.negf %102 : vector<8x32xf32>
    %104 = math.exp %103 : vector<8x32xf32>
    %cst_38 = arith.constant 1.000000e+00 : f32
    %105 = vector.broadcast %cst_38 : f32 to vector<8x32xf32>
    %106 = arith.addf %105, %104 : vector<8x32xf32>
    %107 = arith.divf %105, %106 : vector<8x32xf32>
    %108 = arith.mulf %99, %76 : vector<8x32xf32>
    %109 = arith.mulf %93, %101 : vector<8x32xf32>
    %110 = arith.addf %108, %109 : vector<8x32xf32>
    %111 = math.tanh %110 : vector<8x32xf32>
    %112 = arith.mulf %107, %111 : vector<8x32xf32>
    %113 = arith.index_cast %c2_i32 : i32 to index
    %c0_39 = arith.constant 0 : index
    %c0_40 = arith.constant 0 : index
    %114 = vector.load %arg6[%113, %c0_39, %c0_40] : memref<8x8x32xf32, #tpu.memory_space<vmem>>, vector<1x8x32xf32>
    %115 = vector.shape_cast %114 : vector<1x8x32xf32> to vector<8x32xf32>
    %116 = vector.shape_cast %112 : vector<8x32xf32> to vector<1x8x32xf32>
    tpu.vector_store %arg6[%113, %c0_39, %c0_40], %116 {strides = array<i32>} : memref<8x8x32xf32, #tpu.memory_space<vmem>>, vector<1x8x32xf32>,
    %c3_i32 = arith.constant 3 : i32
    %117 = arith.index_cast %c3_i32 : i32 to index
    %c0_41 = arith.constant 0 : index
    %c0_42 = arith.constant 0 : index
    %118 = vector.load %arg9[%117, %c0_41, %c0_42] : memref<8x8x128xf32, #tpu.memory_space<vmem>>, vector<1x8x128xf32>
    %119 = vector.shape_cast %118 : vector<1x8x128xf32> to vector<8x128xf32>
    %cst_43 = arith.constant dense<0.000000e+00> : vector<8x128xf32>
    %120 = tpu.matmul %112, %12, %cst_43 {dimension_numbers = #tpu.dot_dimension_numbers<[1], [0], [0], [1], [0, 0, 1, 1], [], []>} : vector<8x32xf32>, vector<32x128xf32>, vector<8x128xf32> -> vector<8x128xf32>
    %121 = arith.addf %119, %120 : vector<8x128xf32>
    %122 = vector.extract_strided_slice %121 {offsets = [0, 0], sizes = [8, 32], strides = [1, 1]} : vector<8x128xf32> to vector<8x32xf32>
    %123 = arith.negf %122 : vector<8x32xf32>
    %124 = math.exp %123 : vector<8x32xf32>
    %cst_44 = arith.constant 1.000000e+00 : f32
    %125 = vector.broadcast %cst_44 : f32 to vector<8x32xf32>
    %126 = arith.addf %125, %124 : vector<8x32xf32>
    %127 = arith.divf %125, %126 : vector<8x32xf32>
    %128 = vector.extract_strided_slice %121 {offsets = [0, 32], sizes = [8, 32], strides = [1, 1]} : vector<8x128xf32> to vector<8x32xf32>
    %129 = arith.negf %128 : vector<8x32xf32>
    %130 = math.exp %129 : vector<8x32xf32>
    %cst_45 = arith.constant 1.000000e+00 : f32
    %131 = vector.broadcast %cst_45 : f32 to vector<8x32xf32>
    %132 = arith.addf %131, %130 : vector<8x32xf32>
    %133 = arith.divf %131, %132 : vector<8x32xf32>
    %134 = vector.extract_strided_slice %121 {offsets = [0, 64], sizes = [8, 32], strides = [1, 1]} : vector<8x128xf32> to vector<8x32xf32>
    %135 = math.tanh %134 : vector<8x32xf32>
    %136 = vector.extract_strided_slice %121 {offsets = [0, 96], sizes = [8, 32], strides = [1, 1]} : vector<8x128xf32> to vector<8x32xf32>
    %137 = arith.negf %136 : vector<8x32xf32>
    %138 = math.exp %137 : vector<8x32xf32>
    %cst_46 = arith.constant 1.000000e+00 : f32
    %139 = vector.broadcast %cst_46 : f32 to vector<8x32xf32>
    %140 = arith.addf %139, %138 : vector<8x32xf32>
    %141 = arith.divf %139, %140 : vector<8x32xf32>
    %142 = arith.mulf %133, %110 : vector<8x32xf32>
    %143 = arith.mulf %127, %135 : vector<8x32xf32>
    %144 = arith.addf %142, %143 : vector<8x32xf32>
    %145 = math.tanh %144 : vector<8x32xf32>
    %146 = arith.mulf %141, %145 : vector<8x32xf32>
    %147 = arith.index_cast %c3_i32 : i32 to index
    %c0_47 = arith.constant 0 : index
    %c0_48 = arith.constant 0 : index
    %148 = vector.load %arg6[%147, %c0_47, %c0_48] : memref<8x8x32xf32, #tpu.memory_space<vmem>>, vector<1x8x32xf32>
    %149 = vector.shape_cast %148 : vector<1x8x32xf32> to vector<8x32xf32>
    %150 = vector.shape_cast %146 : vector<8x32xf32> to vector<1x8x32xf32>
    tpu.vector_store %arg6[%147, %c0_47, %c0_48], %150 {strides = array<i32>} : memref<8x8x32xf32, #tpu.memory_space<vmem>>, vector<1x8x32xf32>,
    %c4_i32 = arith.constant 4 : i32
    %151 = arith.index_cast %c4_i32 : i32 to index
    %c0_49 = arith.constant 0 : index
    %c0_50 = arith.constant 0 : index
    %152 = vector.load %arg9[%151, %c0_49, %c0_50] : memref<8x8x128xf32, #tpu.memory_space<vmem>>, vector<1x8x128xf32>
    %153 = vector.shape_cast %152 : vector<1x8x128xf32> to vector<8x128xf32>
    %cst_51 = arith.constant dense<0.000000e+00> : vector<8x128xf32>
    %154 = tpu.matmul %146, %12, %cst_51 {dimension_numbers = #tpu.dot_dimension_numbers<[1], [0], [0], [1], [0, 0, 1, 1], [], []>} : vector<8x32xf32>, vector<32x128xf32>, vector<8x128xf32> -> vector<8x128xf32>
    %155 = arith.addf %153, %154 : vector<8x128xf32>
    %156 = vector.extract_strided_slice %155 {offsets = [0, 0], sizes = [8, 32], strides = [1, 1]} : vector<8x128xf32> to vector<8x32xf32>
    %157 = arith.negf %156 : vector<8x32xf32>
    %158 = math.exp %157 : vector<8x32xf32>
    %cst_52 = arith.constant 1.000000e+00 : f32
    %159 = vector.broadcast %cst_52 : f32 to vector<8x32xf32>
    %160 = arith.addf %159, %158 : vector<8x32xf32>
    %161 = arith.divf %159, %160 : vector<8x32xf32>
    %162 = vector.extract_strided_slice %155 {offsets = [0, 32], sizes = [8, 32], strides = [1, 1]} : vector<8x128xf32> to vector<8x32xf32>
    %163 = arith.negf %162 : vector<8x32xf32>
    %164 = math.exp %163 : vector<8x32xf32>
    %cst_53 = arith.constant 1.000000e+00 : f32
    %165 = vector.broadcast %cst_53 : f32 to vector<8x32xf32>
    %166 = arith.addf %165, %164 : vector<8x32xf32>
    %167 = arith.divf %165, %166 : vector<8x32xf32>
    %168 = vector.extract_strided_slice %155 {offsets = [0, 64], sizes = [8, 32], strides = [1, 1]} : vector<8x128xf32> to vector<8x32xf32>
    %169 = math.tanh %168 : vector<8x32xf32>
    %170 = vector.extract_strided_slice %155 {offsets = [0, 96], sizes = [8, 32], strides = [1, 1]} : vector<8x128xf32> to vector<8x32xf32>
    %171 = arith.negf %170 : vector<8x32xf32>
    %172 = math.exp %171 : vector<8x32xf32>
    %cst_54 = arith.constant 1.000000e+00 : f32
    %173 = vector.broadcast %cst_54 : f32 to vector<8x32xf32>
    %174 = arith.addf %173, %172 : vector<8x32xf32>
    %175 = arith.divf %173, %174 : vector<8x32xf32>
    %176 = arith.mulf %167, %144 : vector<8x32xf32>
    %177 = arith.mulf %161, %169 : vector<8x32xf32>
    %178 = arith.addf %176, %177 : vector<8x32xf32>
    %179 = math.tanh %178 : vector<8x32xf32>
    %180 = arith.mulf %175, %179 : vector<8x32xf32>
    %181 = arith.index_cast %c4_i32 : i32 to index
    %c0_55 = arith.constant 0 : index
    %c0_56 = arith.constant 0 : index
    %182 = vector.load %arg6[%181, %c0_55, %c0_56] : memref<8x8x32xf32, #tpu.memory_space<vmem>>, vector<1x8x32xf32>
    %183 = vector.shape_cast %182 : vector<1x8x32xf32> to vector<8x32xf32>
    %184 = vector.shape_cast %180 : vector<8x32xf32> to vector<1x8x32xf32>
    tpu.vector_store %arg6[%181, %c0_55, %c0_56], %184 {strides = array<i32>} : memref<8x8x32xf32, #tpu.memory_space<vmem>>, vector<1x8x32xf32>,
    %c5_i32 = arith.constant 5 : i32
    %185 = arith.index_cast %c5_i32 : i32 to index
    %c0_57 = arith.constant 0 : index
    %c0_58 = arith.constant 0 : index
    %186 = vector.load %arg9[%185, %c0_57, %c0_58] : memref<8x8x128xf32, #tpu.memory_space<vmem>>, vector<1x8x128xf32>
    %187 = vector.shape_cast %186 : vector<1x8x128xf32> to vector<8x128xf32>
    %cst_59 = arith.constant dense<0.000000e+00> : vector<8x128xf32>
    %188 = tpu.matmul %180, %12, %cst_59 {dimension_numbers = #tpu.dot_dimension_numbers<[1], [0], [0], [1], [0, 0, 1, 1], [], []>} : vector<8x32xf32>, vector<32x128xf32>, vector<8x128xf32> -> vector<8x128xf32>
    %189 = arith.addf %187, %188 : vector<8x128xf32>
    %190 = vector.extract_strided_slice %189 {offsets = [0, 0], sizes = [8, 32], strides = [1, 1]} : vector<8x128xf32> to vector<8x32xf32>
    %191 = arith.negf %190 : vector<8x32xf32>
    %192 = math.exp %191 : vector<8x32xf32>
    %cst_60 = arith.constant 1.000000e+00 : f32
    %193 = vector.broadcast %cst_60 : f32 to vector<8x32xf32>
    %194 = arith.addf %193, %192 : vector<8x32xf32>
    %195 = arith.divf %193, %194 : vector<8x32xf32>
    %196 = vector.extract_strided_slice %189 {offsets = [0, 32], sizes = [8, 32], strides = [1, 1]} : vector<8x128xf32> to vector<8x32xf32>
    %197 = arith.negf %196 : vector<8x32xf32>
    %198 = math.exp %197 : vector<8x32xf32>
    %cst_61 = arith.constant 1.000000e+00 : f32
    %199 = vector.broadcast %cst_61 : f32 to vector<8x32xf32>
    %200 = arith.addf %199, %198 : vector<8x32xf32>
    %201 = arith.divf %199, %200 : vector<8x32xf32>
    %202 = vector.extract_strided_slice %189 {offsets = [0, 64], sizes = [8, 32], strides = [1, 1]} : vector<8x128xf32> to vector<8x32xf32>
    %203 = math.tanh %202 : vector<8x32xf32>
    %204 = vector.extract_strided_slice %189 {offsets = [0, 96], sizes = [8, 32], strides = [1, 1]} : vector<8x128xf32> to vector<8x32xf32>
    %205 = arith.negf %204 : vector<8x32xf32>
    %206 = math.exp %205 : vector<8x32xf32>
    %cst_62 = arith.constant 1.000000e+00 : f32
    %207 = vector.broadcast %cst_62 : f32 to vector<8x32xf32>
    %208 = arith.addf %207, %206 : vector<8x32xf32>
    %209 = arith.divf %207, %208 : vector<8x32xf32>
    %210 = arith.mulf %201, %178 : vector<8x32xf32>
    %211 = arith.mulf %195, %203 : vector<8x32xf32>
    %212 = arith.addf %210, %211 : vector<8x32xf32>
    %213 = math.tanh %212 : vector<8x32xf32>
    %214 = arith.mulf %209, %213 : vector<8x32xf32>
    %215 = arith.index_cast %c5_i32 : i32 to index
    %c0_63 = arith.constant 0 : index
    %c0_64 = arith.constant 0 : index
    %216 = vector.load %arg6[%215, %c0_63, %c0_64] : memref<8x8x32xf32, #tpu.memory_space<vmem>>, vector<1x8x32xf32>
    %217 = vector.shape_cast %216 : vector<1x8x32xf32> to vector<8x32xf32>
    %218 = vector.shape_cast %214 : vector<8x32xf32> to vector<1x8x32xf32>
    tpu.vector_store %arg6[%215, %c0_63, %c0_64], %218 {strides = array<i32>} : memref<8x8x32xf32, #tpu.memory_space<vmem>>, vector<1x8x32xf32>,
    %c6_i32 = arith.constant 6 : i32
    %219 = arith.index_cast %c6_i32 : i32 to index
    %c0_65 = arith.constant 0 : index
    %c0_66 = arith.constant 0 : index
    %220 = vector.load %arg9[%219, %c0_65, %c0_66] : memref<8x8x128xf32, #tpu.memory_space<vmem>>, vector<1x8x128xf32>
    %221 = vector.shape_cast %220 : vector<1x8x128xf32> to vector<8x128xf32>
    %cst_67 = arith.constant dense<0.000000e+00> : vector<8x128xf32>
    %222 = tpu.matmul %214, %12, %cst_67 {dimension_numbers = #tpu.dot_dimension_numbers<[1], [0], [0], [1], [0, 0, 1, 1], [], []>} : vector<8x32xf32>, vector<32x128xf32>, vector<8x128xf32> -> vector<8x128xf32>
    %223 = arith.addf %221, %222 : vector<8x128xf32>
    %224 = vector.extract_strided_slice %223 {offsets = [0, 0], sizes = [8, 32], strides = [1, 1]} : vector<8x128xf32> to vector<8x32xf32>
    %225 = arith.negf %224 : vector<8x32xf32>
    %226 = math.exp %225 : vector<8x32xf32>
    %cst_68 = arith.constant 1.000000e+00 : f32
    %227 = vector.broadcast %cst_68 : f32 to vector<8x32xf32>
    %228 = arith.addf %227, %226 : vector<8x32xf32>
    %229 = arith.divf %227, %228 : vector<8x32xf32>
    %230 = vector.extract_strided_slice %223 {offsets = [0, 32], sizes = [8, 32], strides = [1, 1]} : vector<8x128xf32> to vector<8x32xf32>
    %231 = arith.negf %230 : vector<8x32xf32>
    %232 = math.exp %231 : vector<8x32xf32>
    %cst_69 = arith.constant 1.000000e+00 : f32
    %233 = vector.broadcast %cst_69 : f32 to vector<8x32xf32>
    %234 = arith.addf %233, %232 : vector<8x32xf32>
    %235 = arith.divf %233, %234 : vector<8x32xf32>
    %236 = vector.extract_strided_slice %223 {offsets = [0, 64], sizes = [8, 32], strides = [1, 1]} : vector<8x128xf32> to vector<8x32xf32>
    %237 = math.tanh %236 : vector<8x32xf32>
    %238 = vector.extract_strided_slice %223 {offsets = [0, 96], sizes = [8, 32], strides = [1, 1]} : vector<8x128xf32> to vector<8x32xf32>
    %239 = arith.negf %238 : vector<8x32xf32>
    %240 = math.exp %239 : vector<8x32xf32>
    %cst_70 = arith.constant 1.000000e+00 : f32
    %241 = vector.broadcast %cst_70 : f32 to vector<8x32xf32>
    %242 = arith.addf %241, %240 : vector<8x32xf32>
    %243 = arith.divf %241, %242 : vector<8x32xf32>
    %244 = arith.mulf %235, %212 : vector<8x32xf32>
    %245 = arith.mulf %229, %237 : vector<8x32xf32>
    %246 = arith.addf %244, %245 : vector<8x32xf32>
    %247 = math.tanh %246 : vector<8x32xf32>
    %248 = arith.mulf %243, %247 : vector<8x32xf32>
    %249 = arith.index_cast %c6_i32 : i32 to index
    %c0_71 = arith.constant 0 : index
    %c0_72 = arith.constant 0 : index
    %250 = vector.load %arg6[%249, %c0_71, %c0_72] : memref<8x8x32xf32, #tpu.memory_space<vmem>>, vector<1x8x32xf32>
    %251 = vector.shape_cast %250 : vector<1x8x32xf32> to vector<8x32xf32>
    %252 = vector.shape_cast %248 : vector<8x32xf32> to vector<1x8x32xf32>
    tpu.vector_store %arg6[%249, %c0_71, %c0_72], %252 {strides = array<i32>} : memref<8x8x32xf32, #tpu.memory_space<vmem>>, vector<1x8x32xf32>,
    %c7_i32 = arith.constant 7 : i32
    %253 = arith.index_cast %c7_i32 : i32 to index
    %c0_73 = arith.constant 0 : index
    %c0_74 = arith.constant 0 : index
    %254 = vector.load %arg9[%253, %c0_73, %c0_74] : memref<8x8x128xf32, #tpu.memory_space<vmem>>, vector<1x8x128xf32>
    %255 = vector.shape_cast %254 : vector<1x8x128xf32> to vector<8x128xf32>
    %cst_75 = arith.constant dense<0.000000e+00> : vector<8x128xf32>
    %256 = tpu.matmul %248, %12, %cst_75 {dimension_numbers = #tpu.dot_dimension_numbers<[1], [0], [0], [1], [0, 0, 1, 1], [], []>} : vector<8x32xf32>, vector<32x128xf32>, vector<8x128xf32> -> vector<8x128xf32>
    %257 = arith.addf %255, %256 : vector<8x128xf32>
    %258 = vector.extract_strided_slice %257 {offsets = [0, 0], sizes = [8, 32], strides = [1, 1]} : vector<8x128xf32> to vector<8x32xf32>
    %259 = arith.negf %258 : vector<8x32xf32>
    %260 = math.exp %259 : vector<8x32xf32>
    %cst_76 = arith.constant 1.000000e+00 : f32
    %261 = vector.broadcast %cst_76 : f32 to vector<8x32xf32>
    %262 = arith.addf %261, %260 : vector<8x32xf32>
    %263 = arith.divf %261, %262 : vector<8x32xf32>
    %264 = vector.extract_strided_slice %257 {offsets = [0, 32], sizes = [8, 32], strides = [1, 1]} : vector<8x128xf32> to vector<8x32xf32>
    %265 = arith.negf %264 : vector<8x32xf32>
    %266 = math.exp %265 : vector<8x32xf32>
    %cst_77 = arith.constant 1.000000e+00 : f32
    %267 = vector.broadcast %cst_77 : f32 to vector<8x32xf32>
    %268 = arith.addf %267, %266 : vector<8x32xf32>
    %269 = arith.divf %267, %268 : vector<8x32xf32>
    %270 = vector.extract_strided_slice %257 {offsets = [0, 64], sizes = [8, 32], strides = [1, 1]} : vector<8x128xf32> to vector<8x32xf32>
    %271 = math.tanh %270 : vector<8x32xf32>
    %272 = vector.extract_strided_slice %257 {offsets = [0, 96], sizes = [8, 32], strides = [1, 1]} : vector<8x128xf32> to vector<8x32xf32>
    %273 = arith.negf %272 : vector<8x32xf32>
    %274 = math.exp %273 : vector<8x32xf32>
    %cst_78 = arith.constant 1.000000e+00 : f32
    %275 = vector.broadcast %cst_78 : f32 to vector<8x32xf32>
    %276 = arith.addf %275, %274 : vector<8x32xf32>
    %277 = arith.divf %275, %276 : vector<8x32xf32>
    %278 = arith.mulf %269, %246 : vector<8x32xf32>
    %279 = arith.mulf %263, %271 : vector<8x32xf32>
    %280 = arith.addf %278, %279 : vector<8x32xf32>
    %281 = math.tanh %280 : vector<8x32xf32>
    %282 = arith.mulf %277, %281 : vector<8x32xf32>
    %283 = arith.index_cast %c7_i32 : i32 to index
    %c0_79 = arith.constant 0 : index
    %c0_80 = arith.constant 0 : index
    %284 = vector.load %arg6[%283, %c0_79, %c0_80] : memref<8x8x32xf32, #tpu.memory_space<vmem>>, vector<1x8x32xf32>
    %285 = vector.shape_cast %284 : vector<1x8x32xf32> to vector<8x32xf32>
    %286 = vector.shape_cast %282 : vector<8x32xf32> to vector<1x8x32xf32>
    tpu.vector_store %arg6[%283, %c0_79, %c0_80], %286 {strides = array<i32>} : memref<8x8x32xf32, #tpu.memory_space<vmem>>, vector<1x8x32xf32>,
    %c8_i32 = arith.constant 8 : i32
    %c0_81 = arith.constant 0 : index
    %c0_82 = arith.constant 0 : index
    %287 = vector.load %arg10[%c0_81, %c0_82] : memref<8x32xf32, #tpu.memory_space<vmem>>, vector<8x32xf32>
    tpu.vector_store %arg10[%c0_81, %c0_82], %282 {strides = array<i32>} : memref<8x32xf32, #tpu.memory_space<vmem>>, vector<8x32xf32>,
    %c0_83 = arith.constant 0 : index
    %c0_84 = arith.constant 0 : index
    %288 = vector.load %arg11[%c0_83, %c0_84] : memref<8x32xf32, #tpu.memory_space<vmem>>, vector<8x32xf32>
    tpu.vector_store %arg11[%c0_83, %c0_84], %280 {strides = array<i32>} : memref<8x32xf32, #tpu.memory_space<vmem>>, vector<8x32xf32>,
    %c0_85 = arith.constant 0 : index
    %c0_86 = arith.constant 0 : index
    %289 = vector.load %arg7[%c0_85, %c0_86] : memref<8x32xf32, #tpu.memory_space<vmem>>, vector<8x32xf32>
    tpu.vector_store %arg7[%c0_85, %c0_86], %282 {strides = array<i32>} : memref<8x32xf32, #tpu.memory_space<vmem>>, vector<8x32xf32>,
    %c0_87 = arith.constant 0 : index
    %c0_88 = arith.constant 0 : index
    %290 = vector.load %arg8[%c0_87, %c0_88] : memref<8x32xf32, #tpu.memory_space<vmem>>, vector<8x32xf32>
    tpu.vector_store %arg8[%c0_87, %c0_88], %280 {strides = array<i32>} : memref<8x32xf32, #tpu.memory_space<vmem>>, vector<8x32xf32>,
    return
  }
  func.func @transform_0(%arg0: i32, %arg1: i32) -> (i32, i32, i32) {
    %c0_i32 = arith.constant 0 : i32
    %c0_i32_0 = arith.constant 0 : i32
    return %arg1, %arg0, %c0_i32 : i32, i32, i32
  }
  func.func @transform_1(%arg0: i32, %arg1: i32) -> (i32, i32) {
    %c0_i32 = arith.constant 0 : i32
    %c0_i32_0 = arith.constant 0 : i32
    %c0_i32_1 = arith.constant 0 : i32
    return %c0_i32, %c0_i32_0 : i32, i32
  }
  func.func @transform_2(%arg0: i32, %arg1: i32) -> (i32, i32) {
    %c0_i32 = arith.constant 0 : i32
    %c0_i32_0 = arith.constant 0 : i32
    %c0_i32_1 = arith.constant 0 : i32
    return %c0_i32, %c0_i32_0 : i32, i32
  }
  func.func @transform_3(%arg0: i32, %arg1: i32) -> (i32, i32) {
    %c0_i32 = arith.constant 0 : i32
    %c0_i32_0 = arith.constant 0 : i32
    %c0_i32_1 = arith.constant 0 : i32
    return %c0_i32, %c0_i32_0 : i32, i32
  }
  func.func @transform_4(%arg0: i32, %arg1: i32) -> (i32, i32, i32) {
    %c0_i32 = arith.constant 0 : i32
    %c0_i32_0 = arith.constant 0 : i32
    return %arg1, %arg0, %c0_i32 : i32, i32, i32
  }
  func.func @transform_5(%arg0: i32, %arg1: i32) -> (i32, i32) {
    %c0_i32 = arith.constant 0 : i32
    %c0_i32_0 = arith.constant 0 : i32
    return %arg0, %c0_i32 : i32, i32
  }
  func.func @transform_6(%arg0: i32, %arg1: i32) -> (i32, i32) {
    %c0_i32 = arith.constant 0 : i32
    %c0_i32_0 = arith.constant 0 : i32
    return %arg0, %c0_i32 : i32, i32
  }
}

</mosaic_0001>

<bundles_post_ra>
// kernel: tpu_custom_call.1
= control target key start
LH: loop header
LB: loop body
LE: loop exit
PB: predicated region body
PF: predicated region fallthrough
CT: control target
= control target key end

     0   :  { %12 = vsyncpa [#allocation6], 0  ;;  %vm70_vm0 = vcmask 1043456   ;;  %v1458_v3 = vmov 0.0|0.0   ;;  %vm45_vm1 = vcmask 31744   ;;  %vm26_vm2 = vcmask 261120   ;;  %s1735_s0 = inlined_call_operand.vmem [shape: f32[8,8,4], index: 0, kind: input, shape index: {}]   ;;  %s1736_s1 = inlined_call_operand.vmem [shape: f32[4,128], index: 1, kind: input, shape index: {}]   ;;  %s1737_s2 = inlined_call_operand.vmem [shape: f32[32,128], index: 2, kind: input, shape index: {}]   ;;  %s1738_s3 = inlined_call_operand.vmem [shape: f32[1,128], index: 3, kind: input, shape index: {}]   ;;  %s1739_s4 = inlined_call_operand.hbm [shape: f32[8,8,32], index: 4, kind: output, shape index: {0}]   ;;  %s1740_s5 = inlined_call_operand.hbm [shape: f32[8,32], index: 5, kind: output, shape index: {1}]   ;;  %s1741_s6 = inlined_call_operand.hbm [shape: f32[8,32], index: 6, kind: output, shape index: {2}]  }
   0x1   :  { %v187_v0 = vld [vmem:[%s1737_s2] sm:$0xff]  ;;  %v188_v1 = vld [vmem:[%s1737_s2 + $0x8] sm:$0xff]  ;;  %1265 = vmatprep.subr.bf16.mxu1 %v1458_v3  ;;  %v189_v7 = vld [vmem:[%s1737_s2 + $0x10] sm:$0xff] }
   0x2   :  { %v37_v2 = vld [vmem:[%s1736_s1] sm:$0xf]  ;;  %v1514_v4 = vpack.c.bf16 %v188_v1, %v187_v0  ;;  %v30_v6 = vld [vmem:[%s1735_s0 + $0x8] sm:$0xff]  ;;  %v190_v8 = vld [vmem:[%s1737_s2 + $0x18] sm:$0xff] }
   0x3   :  { %1163 = vmatprep.subr.msk.mxu0 %vm70_vm0, %v37_v2  ;;  %v29_v5 = vld [vmem:[%s1735_s0] sm:$0xff] }
   0x4   :  { %1164 = vmatpush3.msk.msra.mxu0 %vm70_vm0, %v37_v2  ;;  %1165 = vmatprep.mubr.msk.f32.mxu0 %vm45_vm1, %v29_v5 }
   0x5   :  { %13 = vsyncpa [#allocation8], 0  ;;  %1267 = vmatpush3.bf16.msra.mxu1 %v1514_v4  ;;  %1166 = vmatmul.mubr.msk.f32.vlgmr.msra.gmra.mrb[0].mxu0 %vm45_vm1, %v30_v6  ;;  %v1531_v9 = vpack.c.bf16 %v190_v8, %v189_v7  ;;  %v1459_v10 = vmov 0.0   ;;  %vm1460_vm3 = vmmov 0   ;;  %v1557_v14 = vld [vmem:[%s1738_s3] ss:$0 sm:$0xff] }
   0x6   :  { %27 = vst.msk [vmem:[#allocation3] sm:$0xff] %vm26_vm2, %v1459_v10  ;;  %28 = vst.msk [vmem:[#allocation4] sm:$0xff] %vm26_vm2, %v1459_v10  ;;  %1268 = vmatprep.subr.bf16.mxu1 %v1458_v3  ;;  %1185 = vmatprep.mubr.msk.f32.mxu1 %vm1460_vm3, %v1459_v10  ;;  %s1461_s11 = smov 64   ;;  %s1462_s12 = smov 32   ;;  %v31_v49 = vld [vmem:[%s1735_s0 + $0x10] sm:$0xff]  ;;  %v32_v50 = vld [vmem:[%s1735_s0 + $0x18] sm:$0xff] }
   0x7   :  { %1277 = vmatprep.subr.bf16.mxu0 %v1458_v3  ;;  %v33_v51 = vld [vmem:[%s1735_s0 + $0x20] sm:$0xff]  ;;  %1168 = vmatprep.mubr.msk.f32.mxu0 %vm45_vm1, %v31_v49  ;;  %v34_v52 = vld [vmem:[%s1735_s0 + $0x28] sm:$0xff]  ;;  %v35_v53 = vld [vmem:[%s1735_s0 + $0x30] sm:$0xff]  ;;  %s1464_s24 = smov [#allocation7]   ;;  %s1465_s26 = smov [#allocation5]  }
   0x8   :  { %1279 = vmatpush3.bf16.msra.mxu0 %v1514_v4  ;;  %v36_v54 = vld [vmem:[%s1735_s0 + $0x38] sm:$0xff]  ;;  %s1463_s0 = smov 96   ;;  %s1063_s25 = sshll.u32 %s1464_s24, 4  ;;  %s1064_s25 = int_to_ptr.vmem [resolvable:$true] %s1063_s25 }
   0x9   :  { %1270 = vmatpush3.bf16.msra.mxu1 %v1531_v9  ;;  %1280 = vmatprep.subr.bf16.mxu0 %v1458_v3  ;;  %s1050_s27 = sshll.u32 %s1465_s26, 4  ;;  %s1466_s28 = smov [#allocation9]   ;;  %s1682_s27 = int_to_ptr.vmem [resolvable:$true] %s1050_s27 }
   0xa   :  { %1271 = vmatprep.subr.bf16.mxu1 %v1458_v3  ;;  %1169 = vmatmul.mubr.msk.f32.gmra.mrb[2].mxu0 %vm45_vm1, %v32_v50  ;;  %s1073_s29 = sshll.u32 %s1466_s28, 4  ;;  %s1388_s30 = scalar_lea.vmem %s1064_s25, 128  ;;  %s1687_s29 = int_to_ptr.vmem [resolvable:$true] %s1073_s29 }
   0xb   :  { %1171 = vmatprep.mubr.msk.f32.mxu0 %vm45_vm1, %v33_v51  ;;  %p1389_p0 = scmp.ne.s32.totalorder %s1064_s25, %s1388_s30  ;;  %p1393_p1 = scmp.lt.s32.totalorder %s1064_s25, %s1064_s25 }
   0xc   :  { %1282 = vmatpush3.bf16.msra.mxu0 %v1531_v9  ;;  %p1394_p2 = scmp.lt.s32.totalorder %s1388_s30, %s1388_s30 }
   0xd   :  { %v191_v11 = vld [vmem:[#allocation3] sm:$0xff]  ;;  %1289 = vmatprep.subr.bf16.mxu0 %v1458_v3  ;;  %v192_v20 = vld [vmem:[#allocation4] sm:$0xff] }
   0xe   :  { %1186 = vmatmul.mubr.msk.f32.vlgmr.msra.gmra.mrb[0].mxu1 %vm26_vm2, %v191_v11  ;;  %1172 = vmatmul.mubr.msk.f32.gmra.mrb[4].mxu0 %vm45_vm1, %v34_v52  ;;  %p1395_p3 = por %p1394_p2, %p1393_p1 }
   0xf   :  { %1273 = vmatpush3.bf16.msra.mxu1 %v1514_v4  ;;  %1196 = vmatprep.mubr.msk.f32.mxu1 %vm1460_vm3, %v1459_v10 }
  0x10   :  { %1274 = vmatprep.subr.bf16.mxu1 %v1458_v3  ;;  %1174 = vmatprep.mubr.msk.f32.mxu0 %vm45_vm1, %v35_v53  ;;  %p1396_p4 = pnand %p1395_p3, %p1389_p0 }
  0x12   :  { %1175 = vmatmul.mubr.msk.f32.gmra.mrb[6].mxu0 %vm45_vm1, %v36_v54 }
  0x13   :  { %1276 = vmatpush3.bf16.msra.mxu1 %v1531_v9  ;;  %1207 = vmatprep.mubr.msk.f32.mxu0 %vm1460_vm3, %v1459_v10 }
  0x14   :  { %1283 = vmatprep.subr.bf16.mxu1 %v1458_v3 }
  0xd8   :  { %v1167_v12 = vpop.f32.mrb[0].mxu0 }
  0xd9   :  { %v140_v13 = vpop.f32.mrb[1].mxu0  ;;  %v146_v35 = vadd.f32 %v1167_v12, %v1557_v14 }
  0xda   :  { %v141_v15 = vadd.f32 %v1557_v14, %v140_v13 }
  0xdd   :  { %v1170_v58 = vpop.f32.mrb[2].mxu0 }
  0xde   :  { %v150_v59 = vpop.f32.mrb[3].mxu0 }
  0xdf   :  { %v151_v1 = vadd.f32 %v1557_v14, %v150_v59 }
  0xe1   :  { %v264_v16 = vpop.f32.mrb[0].mxu1  ;;  %v1604_v60 = vpop.f32.mrb[4].mxu0 }
  0xe2   :  { %v268_v17 = vadd.f32 %v264_v16, %v141_v15  ;;  %v1187_v18 = vpop.f32.mrb[1].mxu1  ;;  %v1606_v61 = vpop.f32.mrb[5].mxu0 }
  0xe4   :  { %1324 = vtanh.f32 %v268_v17  ;;  %v1099_v21 = vmul.f32 -1.442695, %v268_v17 }
  0xe5   :  { %v1608_v62 = vpop.f32.mrb[6].mxu0 }
  0xe6   :  { %1326 = vpow2.f32 %v1099_v21  ;;  %v1610_v63 = vpop.f32.mrb[7].mxu0 }
  0xee   :  { %v1325_v19 = vpop.eup %1324 }
  0xef   :  { %282 = vrot.lane.b32.xlu0 %v1325_v19, %s1461_s11 }
  0xf0   :  { %v1327_v22 = vpop.eup %1326 }
  0xf1   :  { %v272_v23 = vadd.f32 1.0, %v1327_v22 }
  0xf3   :  { %277 = vrot.lane.b32.xlu0 %v192_v20, %s1462_s12  ;;  %1328 = vrcp.f32 %v272_v23 }
  0xfd   :  { %v1329_v24 = vpop.eup %1328 }
 0x161   :  { %v283_v25 = vpop.permute.xlu0 %282 }
 0x162   :  { %v285_v26 = vmul.f32 %v1329_v24, %v283_v25 }
 0x164   :  { %287 = vrot.lane.b32.xlu1 %v285_v26, %s1462_s12 }
 0x165   :  { %v278_v27 = vpop.permute.xlu0 %277 }
 0x166   :  { %v280_v28 = vmul.f32 %v1329_v24, %v278_v27 }
 0x1d6   :  { %v288_v29 = vpop.permute.xlu1 %287 }
 0x1d7   :  { %v290_v30 = vadd.f32 %v288_v29, %v280_v28 }
 0x1d9   :  { %1330 = vtanh.f32 %v290_v30 }
 0x1e3   :  { %v1331_v31 = vpop.eup %1330 }
 0x1e4   :  { %293 = vrot.lane.b32.xlu1 %v1331_v31, %s1461_s11 }
 0x256   :  { %v294_v32 = vpop.permute.xlu1 %293 }
 0x257   :  { %v296_v33 = vmul.f32 %v1329_v24, %v294_v32  ;;  %v156_v24 = vadd.f32 %v1170_v58, %v1557_v14 }
 0x259   :  { %298 = vrot.lane.b32.xlu0 %v296_v33, %s1462_s12 }
 0x2cb   :  { %v299_v34 = vpop.permute.xlu0 %298 }
 0x2cc   :  { %301 = vst.msk [vmem:[#allocation5] sm:$0xff] %vm26_vm2, %v299_v34  ;;  %1197 = vmatmul.mubr.msk.f32.vlgmr.msra.gmra.mrb[2].mxu1 %vm26_vm2, %v299_v34 }
 0x2cd   :  { %1285 = vmatpush3.bf16.msra.mxu1 %v1514_v4  ;;  %1218 = vmatprep.mubr.msk.f32.mxu1 %vm1460_vm3, %v1459_v10 }
 0x2ce   :  { %1286 = vmatprep.subr.bf16.mxu1 %v1458_v3 }
 0x2d1   :  { %1288 = vmatpush3.bf16.msra.mxu1 %v1531_v9 }
 0x2d2   :  { %1295 = vmatprep.subr.bf16.mxu1 %v1458_v3 }
 0x39f   :  { %v372_v36 = vpop.f32.mrb[2].mxu1 }
 0x3a0   :  { %v376_v37 = vadd.f32 %v372_v36, %v146_v35  ;;  %v1198_v38 = vpop.f32.mrb[3].mxu1 }
 0x3a2   :  { %1332 = vtanh.f32 %v376_v37  ;;  %v1101_v40 = vmul.f32 -1.442695, %v376_v37 }
 0x3a4   :  { %1334 = vpow2.f32 %v1101_v40 }
 0x3ac   :  { %v1333_v39 = vpop.eup %1332 }
 0x3ad   :  { %386 = vrot.lane.b32.xlu1 %v1333_v39, %s1461_s11 }
 0x3ae   :  { %v1335_v41 = vpop.eup %1334 }
 0x3af   :  { %v380_v42 = vadd.f32 1.0, %v1335_v41 }
 0x3b1   :  { %1336 = vrcp.f32 %v380_v42  ;;  %v161_v42 = vadd.f32 %v1557_v14, %v1606_v61  ;;  %v166_v61 = vadd.f32 %v1604_v60, %v1557_v14 }
 0x3bb   :  { %v1337_v43 = vpop.eup %1336 }
 0x3bc   :  { %v384_v46 = vmul.f32 %v1337_v43, %v290_v30 }
 0x41f   :  { %v387_v44 = vpop.permute.xlu1 %386 }
 0x420   :  { %v389_v45 = vmul.f32 %v1337_v43, %v387_v44 }
 0x422   :  { %391 = vrot.lane.b32.xlu0 %v389_v45, %s1462_s12 }
 0x494   :  { %v392_v47 = vpop.permute.xlu0 %391 }
 0x495   :  { %v394_v48 = vadd.f32 %v392_v47, %v384_v46 }
 0x497   :  { %1338 = vtanh.f32 %v394_v48 }
 0x4a1   :  { %v1339_v55 = vpop.eup %1338 }
 0x4a2   :  { %397 = vrot.lane.b32.xlu1 %v1339_v55, %s1461_s11 }
 0x514   :  { %v398_v56 = vpop.permute.xlu1 %397 }
 0x515   :  { %v400_v57 = vmul.f32 %v1337_v43, %v398_v56 }
 0x517   :  { %402 = vrot.lane.b32.xlu0 %v400_v57, %s1462_s12 }
 0x589   :  { %v403_v0 = vpop.permute.xlu0 %402 }
 0x58a   :  { %406 = vst.msk [vmem:[#allocation5 + $0x8] sm:$0xff] %vm26_vm2, %v403_v0  ;;  %1208 = vmatmul.mubr.msk.f32.vlgmr.msra.gmra.mrb[8].mxu0 %vm26_vm2, %v403_v0 }
 0x58b   :  { %1291 = vmatpush3.bf16.msra.mxu0 %v1514_v4  ;;  %1229 = vmatprep.mubr.msk.f32.mxu0 %vm1460_vm3, %v1459_v10 }
 0x58c   :  { %1292 = vmatprep.subr.bf16.mxu0 %v1458_v3 }
 0x58f   :  { %1294 = vmatpush3.bf16.msra.mxu0 %v1531_v9 }
 0x590   :  { %1301 = vmatprep.subr.bf16.mxu0 %v1458_v3 }
 0x65d   :  { %v477_v2 = vpop.f32.mrb[8].mxu0 }
 0x65e   :  { %v481_v5 = vadd.f32 %v477_v2, %v151_v1  ;;  %v1209_v6 = vpop.f32.mrb[9].mxu0 }
 0x660   :  { %1340 = vtanh.f32 %v481_v5  ;;  %v1103_v8 = vmul.f32 -1.442695, %v481_v5 }
 0x662   :  { %1342 = vpow2.f32 %v1103_v8 }
 0x66a   :  { %v1341_v7 = vpop.eup %1340 }
 0x66b   :  { %491 = vrot.lane.b32.xlu1 %v1341_v7, %s1461_s11 }
 0x66c   :  { %v1343_v11 = vpop.eup %1342 }
 0x66d   :  { %v485_v12 = vadd.f32 1.0, %v1343_v11 }
 0x66f   :  { %1344 = vrcp.f32 %v485_v12 }
 0x679   :  { %v1345_v13 = vpop.eup %1344 }
 0x67a   :  { %v489_v17 = vmul.f32 %v1345_v13, %v394_v48 }
 0x6dd   :  { %v492_v15 = vpop.permute.xlu1 %491 }
 0x6de   :  { %v494_v16 = vmul.f32 %v1345_v13, %v492_v15 }
 0x6e0   :  { %496 = vrot.lane.b32.xlu0 %v494_v16, %s1462_s12 }
 0x752   :  { %v497_v18 = vpop.permute.xlu0 %496 }
 0x753   :  { %v499_v19 = vadd.f32 %v497_v18, %v489_v17  ;;  %v171_v17 = vadd.f32 %v1557_v14, %v1610_v63 }
 0x755   :  { %1346 = vtanh.f32 %v499_v19 }
 0x75f   :  { %v1347_v20 = vpop.eup %1346 }
 0x760   :  { %502 = vrot.lane.b32.xlu1 %v1347_v20, %s1461_s11 }
 0x7d2   :  { %v503_v21 = vpop.permute.xlu1 %502 }
 0x7d3   :  { %v505_v22 = vmul.f32 %v1345_v13, %v503_v21 }
 0x7d5   :  { %507 = vrot.lane.b32.xlu0 %v505_v22, %s1462_s12 }
 0x847   :  { %v508_v23 = vpop.permute.xlu0 %507 }
 0x848   :  { %511 = vst.msk [vmem:[#allocation5 + $0x10] sm:$0xff] %vm26_vm2, %v508_v23  ;;  %1219 = vmatmul.mubr.msk.f32.vlgmr.msra.gmra.mrb[4].mxu1 %vm26_vm2, %v508_v23 }
 0x849   :  { %1297 = vmatpush3.bf16.msra.mxu1 %v1514_v4  ;;  %1240 = vmatprep.mubr.msk.f32.mxu1 %vm1460_vm3, %v1459_v10 }
 0x84a   :  { %1298 = vmatprep.subr.bf16.mxu1 %v1458_v3 }
 0x84d   :  { %1300 = vmatpush3.bf16.msra.mxu1 %v1531_v9 }
 0x84e   :  { %1307 = vmatprep.subr.bf16.mxu1 %v1458_v3 }
 0x91b   :  { %v582_v25 = vpop.f32.mrb[4].mxu1 }
 0x91c   :  { %v586_v26 = vadd.f32 %v582_v25, %v156_v24  ;;  %v1220_v27 = vpop.f32.mrb[5].mxu1 }
 0x91e   :  { %1348 = vtanh.f32 %v586_v26  ;;  %v1105_v29 = vmul.f32 -1.442695, %v586_v26 }
 0x920   :  { %1350 = vpow2.f32 %v1105_v29 }
 0x928   :  { %v1349_v28 = vpop.eup %1348 }
 0x929   :  { %596 = vrot.lane.b32.xlu1 %v1349_v28, %s1461_s11 }
 0x92a   :  { %v1351_v30 = vpop.eup %1350 }
 0x92b   :  { %v590_v31 = vadd.f32 1.0, %v1351_v30 }
 0x92d   :  { %1352 = vrcp.f32 %v590_v31 }
 0x937   :  { %v1353_v32 = vpop.eup %1352 }
 0x938   :  { %v594_v35 = vmul.f32 %v1353_v32, %v499_v19 }
 0x99b   :  { %v597_v33 = vpop.permute.xlu1 %596 }
 0x99c   :  { %v599_v34 = vmul.f32 %v1353_v32, %v597_v33 }
 0x99e   :  { %601 = vrot.lane.b32.xlu0 %v599_v34, %s1462_s12  ;;  %v176_v34 = vadd.f32 %v1608_v62, %v1557_v14 }
 0xa10   :  { %v602_v36 = vpop.permute.xlu0 %601 }
 0xa11   :  { %v604_v37 = vadd.f32 %v602_v36, %v594_v35 }
 0xa13   :  { %1354 = vtanh.f32 %v604_v37 }
 0xa1d   :  { %v1355_v38 = vpop.eup %1354 }
 0xa1e   :  { %607 = vrot.lane.b32.xlu1 %v1355_v38, %s1461_s11 }
 0xa90   :  { %v608_v39 = vpop.permute.xlu1 %607 }
 0xa91   :  { %v610_v40 = vmul.f32 %v1353_v32, %v608_v39 }
 0xa93   :  { %612 = vrot.lane.b32.xlu0 %v610_v40, %s1462_s12 }
 0xb05   :  { %v613_v41 = vpop.permute.xlu0 %612 }
 0xb06   :  { %616 = vst.msk [vmem:[#allocation5 + $0x18] sm:$0xff] %vm26_vm2, %v613_v41  ;;  %1230 = vmatmul.mubr.msk.f32.vlgmr.msra.gmra.mrb[10].mxu0 %vm26_vm2, %v613_v41 }
 0xb07   :  { %1303 = vmatpush3.bf16.msra.mxu0 %v1514_v4  ;;  %1251 = vmatprep.mubr.msk.f32.mxu0 %vm1460_vm3, %v1459_v10 }
 0xb08   :  { %1304 = vmatprep.subr.bf16.mxu0 %v1458_v3 }
 0xb0b   :  { %1306 = vmatpush3.bf16.msra.mxu0 %v1531_v9 }
 0xbd9   :  { %v687_v43 = vpop.f32.mrb[10].mxu0 }
 0xbda   :  { %v691_v44 = vadd.f32 %v687_v43, %v161_v42  ;;  %v1231_v45 = vpop.f32.mrb[11].mxu0 }
 0xbdc   :  { %1356 = vtanh.f32 %v691_v44  ;;  %v1107_v47 = vmul.f32 -1.442695, %v691_v44 }
 0xbde   :  { %1358 = vpow2.f32 %v1107_v47 }
 0xbe6   :  { %v1357_v46 = vpop.eup %1356 }
 0xbe7   :  { %701 = vrot.lane.b32.xlu1 %v1357_v46, %s1461_s11 }
 0xbe8   :  { %v1359_v48 = vpop.eup %1358 }
 0xbe9   :  { %v695_v49 = vadd.f32 1.0, %v1359_v48 }
 0xbeb   :  { %1360 = vrcp.f32 %v695_v49 }
 0xbf5   :  { %v1361_v50 = vpop.eup %1360 }
 0xbf6   :  { %v699_v53 = vmul.f32 %v1361_v50, %v604_v37 }
 0xc59   :  { %v702_v51 = vpop.permute.xlu1 %701 }
 0xc5a   :  { %v704_v52 = vmul.f32 %v1361_v50, %v702_v51 }
 0xc5c   :  { %706 = vrot.lane.b32.xlu0 %v704_v52, %s1462_s12 }
 0xcce   :  { %v707_v54 = vpop.permute.xlu0 %706 }
 0xccf   :  { %v709_v55 = vadd.f32 %v707_v54, %v699_v53 }
 0xcd1   :  { %1362 = vtanh.f32 %v709_v55 }
 0xcdb   :  { %v1363_v56 = vpop.eup %1362 }
 0xcdc   :  { %712 = vrot.lane.b32.xlu1 %v1363_v56, %s1461_s11 }
 0xd4e   :  { %v713_v57 = vpop.permute.xlu1 %712 }
 0xd4f   :  { %v715_v58 = vmul.f32 %v1361_v50, %v713_v57 }
 0xd51   :  { %717 = vrot.lane.b32.xlu0 %v715_v58, %s1462_s12 }
 0xdc3   :  { %v718_v59 = vpop.permute.xlu0 %717 }
 0xdc4   :  { %721 = vst.msk [vmem:[#allocation5 + $0x20] sm:$0xff] %vm26_vm2, %v718_v59  ;;  %1241 = vmatmul.mubr.msk.f32.vlgmr.msra.gmra.mrb[6].mxu1 %vm26_vm2, %v718_v59 }
 0xdc5   :  { %1309 = vmatpush3.bf16.msra.mxu1 %v1514_v4  ;;  %1262 = vmatprep.mubr.msk.f32.mxu1 %vm1460_vm3, %v1459_v10 }
 0xdc6   :  { %1310 = vmatprep.subr.bf16.mxu1 %v1458_v3 }
 0xdc9   :  { %1312 = vmatpush3.bf16.msra.mxu1 %v1531_v9 }
 0xe97   :  { %v792_v0 = vpop.f32.mrb[6].mxu1 }
 0xe98   :  { %v796_v1 = vadd.f32 %v792_v0, %v166_v61  ;;  %v1242_v2 = vpop.f32.mrb[7].mxu1 }
 0xe9a   :  { %1364 = vtanh.f32 %v796_v1  ;;  %v1109_v6 = vmul.f32 -1.442695, %v796_v1 }
 0xe9c   :  { %1366 = vpow2.f32 %v1109_v6 }
 0xea4   :  { %v1365_v5 = vpop.eup %1364 }
 0xea5   :  { %806 = vrot.lane.b32.xlu1 %v1365_v5, %s1461_s11 }
 0xea6   :  { %v1367_v4 = vpop.eup %1366 }
 0xea7   :  { %v800_v7 = vadd.f32 1.0, %v1367_v4 }
 0xea9   :  { %1368 = vrcp.f32 %v800_v7 }
 0xeb3   :  { %v1369_v10 = vpop.eup %1368 }
 0xeb4   :  { %v804_v9 = vmul.f32 %v1369_v10, %v709_v55 }
 0xf17   :  { %v807_v8 = vpop.permute.xlu1 %806 }
 0xf18   :  { %v809_v3 = vmul.f32 %v1369_v10, %v807_v8 }
 0xf1a   :  { %811 = vrot.lane.b32.xlu0 %v809_v3, %s1462_s12 }
 0xf8c   :  { %v812_v11 = vpop.permute.xlu0 %811 }
 0xf8d   :  { %v814_v60 = vadd.f32 %v812_v11, %v804_v9 }
 0xf8f   :  { %1370 = vtanh.f32 %v814_v60 }
 0xf99   :  { %v1371_v12 = vpop.eup %1370 }
 0xf9a   :  { %817 = vrot.lane.b32.xlu1 %v1371_v12, %s1461_s11 }
0x100c   :  { %v818_v13 = vpop.permute.xlu1 %817 }
0x100d   :  { %v820_v15 = vmul.f32 %v1369_v10, %v818_v13 }
0x100f   :  { %822 = vrot.lane.b32.xlu0 %v820_v15, %s1462_s12 }
0x1081   :  { %v823_v16 = vpop.permute.xlu0 %822 }
0x1082   :  { %826 = vst.msk [vmem:[#allocation5 + $0x28] sm:$0xff] %vm26_vm2, %v823_v16  ;;  %1252 = vmatmul.mubr.msk.f32.vlgmr.msra.gmra.mrb[12].mxu0 %vm26_vm2, %v823_v16 }
0x1155   :  { %v897_v18 = vpop.f32.mrb[12].mxu0 }
0x1156   :  { %v901_v19 = vadd.f32 %v897_v18, %v171_v17  ;;  %v1253_v20 = vpop.f32.mrb[13].mxu0 }
0x1158   :  { %1372 = vtanh.f32 %v901_v19  ;;  %v1111_v22 = vmul.f32 -1.442695, %v901_v19 }
0x115a   :  { %1374 = vpow2.f32 %v1111_v22 }
0x1162   :  { %v1373_v21 = vpop.eup %1372 }
0x1163   :  { %911 = vrot.lane.b32.xlu1 %v1373_v21, %s1461_s11 }
0x1164   :  { %v1375_v23 = vpop.eup %1374 }
0x1165   :  { %v905_v24 = vadd.f32 1.0, %v1375_v23 }
0x1167   :  { %1376 = vrcp.f32 %v905_v24 }
0x1171   :  { %v1377_v25 = vpop.eup %1376 }
0x1172   :  { %v909_v28 = vmul.f32 %v1377_v25, %v814_v60 }
0x11d5   :  { %v912_v26 = vpop.permute.xlu1 %911 }
0x11d6   :  { %v914_v27 = vmul.f32 %v1377_v25, %v912_v26 }
0x11d8   :  { %916 = vrot.lane.b32.xlu0 %v914_v27, %s1462_s12 }
0x124a   :  { %v917_v29 = vpop.permute.xlu0 %916 }
0x124b   :  { %v919_v63 = vadd.f32 %v917_v29, %v909_v28 }
0x124d   :  { %1378 = vtanh.f32 %v919_v63 }
0x1257   :  { %v1379_v30 = vpop.eup %1378 }
0x1258   :  { %922 = vrot.lane.b32.xlu1 %v1379_v30, %s1461_s11 }
0x12ca   :  { %v923_v31 = vpop.permute.xlu1 %922 }
0x12cb   :  { %v925_v32 = vmul.f32 %v1377_v25, %v923_v31 }
0x12cd   :  { %927 = vrot.lane.b32.xlu0 %v925_v32, %s1462_s12 }
0x133f   :  { %v928_v33 = vpop.permute.xlu0 %927 }
0x1340   :  { %931 = vst.msk [vmem:[#allocation5 + $0x30] sm:$0xff] %vm26_vm2, %v928_v33  ;;  %1263 = vmatmul.mubr.msk.f32.vlgmr.msra.gmra.mrb[8].mxu1 %vm26_vm2, %v928_v33 }
0x1413   :  { %v1002_v35 = vpop.f32.mrb[8].mxu1 }
0x1414   :  { %v1006_v36 = vadd.f32 %v1002_v35, %v176_v34  ;;  %v1264_v37 = vpop.f32.mrb[9].mxu1 }
0x1416   :  { %1380 = vtanh.f32 %v1006_v36  ;;  %v1113_v39 = vmul.f32 -1.442695, %v1006_v36 }
0x1418   :  { %1382 = vpow2.f32 %v1113_v39 }
0x1420   :  { %v1381_v38 = vpop.eup %1380 }
0x1421   :  { %1016 = vrot.lane.b32.xlu1 %v1381_v38, %s1461_s11 }
0x1422   :  { %v1383_v40 = vpop.eup %1382 }
0x1423   :  { %v1010_v41 = vadd.f32 1.0, %v1383_v40 }
0x1425   :  { %1384 = vrcp.f32 %v1010_v41 }
0x142f   :  { %v1385_v42 = vpop.eup %1384 }
0x1430   :  { %v1014_v45 = vmul.f32 %v1385_v42, %v919_v63 }
0x1493   :  { %v1017_v43 = vpop.permute.xlu1 %1016 }
0x1494   :  { %v1019_v44 = vmul.f32 %v1385_v42, %v1017_v43 }
0x1496   :  { %1021 = vrot.lane.b32.xlu0 %v1019_v44, %s1462_s12 }
0x1508   :  { %v1022_v46 = vpop.permute.xlu0 %1021 }
0x1509   :  { %v1024_v14 = vadd.f32 %v1022_v46, %v1014_v45 }
0x150b   :  { %1386 = vtanh.f32 %v1024_v14 }
0x1515   :  { %v1387_v62 = vpop.eup %1386 }
0x1516   :  { %1027 = vrot.lane.b32.xlu1 %v1387_v62, %s1461_s11 }
0x151a   :  { %1039 = vrot.lane.b32.xlu1 %v1024_v14, %s1463_s0 }
0x1588   :  { %v1028_v47 = vpop.permute.xlu1 %1027 }
0x1589   :  { %v1030_v48 = vmul.f32 %v1385_v42, %v1028_v47 }
0x158b   :  { %1032 = vrot.lane.b32.xlu0 %v1030_v48, %s1462_s12 }
0x158c   :  { %v1040_v49 = vpop.permute.xlu1 %1039 }
0x158d   :  { %1042 = vst.msk [vmem:[#allocation4] sm:$0xff] %vm26_vm2, %v1040_v49  ;;  %1044 = vst.msk [vmem:[#allocation9] sm:$0xff] %vm26_vm2, %v1040_v49 }
0x15fd   :  { %v1033_v50 = vpop.permute.xlu0 %1032 }
0x15fe   :  { %1036 = vst.msk [vmem:[#allocation5 + $0x38] sm:$0xff] %vm26_vm2, %v1033_v50  ;;  %1037 = vst.msk [vmem:[#allocation3] sm:$0xff] %vm26_vm2, %v1033_v50 }
0x15ff   :  { %1043 = vst.msk [vmem:[#allocation7] sm:$0xff] %vm26_vm2, %v1033_v50 }
0x1600   :  { %1399 = shalt.err (!%p1396_p4)
}
0x1601   :  { %s1400_s1 = scalar_lea.hbm %s1740_s5, 128 }
0x1602   :  { %p1401_p5 = scmp.ne.s32.totalorder %s1740_s5, %s1400_s1  ;;  %p1404_p6 = scmp.lt.u32.totalorder %s1400_s1, %s1740_s5 }
0x1604   :  { %p1406_p7 = pnand %p1404_p6, %p1401_p5 }
0x1606   :  { %1409 = shalt.err (!%p1406_p7)
}
0x1607   :  { %1066 = dma.vmem_to_hbm [thread:$0]  %s1064_s25, 128, %s1740_s5, [#allocation8]  }
0x1608   :  { %s1410_s13 = scalar_lea.vmem %s1682_s27, 1024  ;;  %p1415_p9 = scmp.lt.s32.totalorder %s1682_s27, %s1682_s27 }
0x1609   :  { %p1411_p8 = scmp.ne.s32.totalorder %s1682_s27, %s1410_s13  ;;  %p1416_p10 = scmp.lt.s32.totalorder %s1410_s13, %s1410_s13 }
0x160b   :  { %p1417_p11 = por %p1416_p10, %p1415_p9 }
0x160d   :  { %p1418_p12 = pnand %p1417_p11, %p1411_p8 }
0x160f   :  { %1421 = shalt.err (!%p1418_p12)
}
0x1610   :  { %s1422_s16 = scalar_lea.hbm %s1739_s4, 1024 }
0x1611   :  { %p1423_p13 = scmp.ne.s32.totalorder %s1739_s4, %s1422_s16  ;;  %p1426_p0 = scmp.lt.u32.totalorder %s1422_s16, %s1739_s4 }
0x1613   :  { %p1428_p1 = pnand %p1426_p0, %p1423_p13 }
0x1615   :  { %1431 = shalt.err (!%p1428_p1)
}
0x1616   :  { %s1467_s5 = smov 128   ;;  %s1468_s21 = smov 8  }
0x1617   :  { %1056 = dma.vmem_to_hbm [thread:$0]  %s1682_s27, 1024, %s1739_s4, [#allocation6], %s1467_s5, %s1467_s5, %s1468_s21  }
0x1618   :  { %s1432_s0 = scalar_lea.vmem %s1687_s29, 128  ;;  %p1437_p3 = scmp.lt.s32.totalorder %s1687_s29, %s1687_s29 }
0x1619   :  { %p1433_p2 = scmp.ne.s32.totalorder %s1687_s29, %s1432_s0  ;;  %p1438_p4 = scmp.lt.s32.totalorder %s1432_s0, %s1432_s0 }
0x161b   :  { %p1439_p5 = por %p1438_p4, %p1437_p3 }
0x161d   :  { %p1440_p6 = pnand %p1439_p5, %p1433_p2 }
0x161f   :  { %1443 = shalt.err (!%p1440_p6)
}
0x1620   :  { %s1444_s26 = scalar_lea.hbm %s1741_s6, 128 }
0x1621   :  { %p1445_p7 = scmp.ne.s32.totalorder %s1741_s6, %s1444_s26  ;;  %p1448_p8 = scmp.lt.u32.totalorder %s1444_s26, %s1741_s6 }
0x1623   :  { %p1450_p9 = pnand %p1448_p8, %p1445_p7 }
0x1625   :  { %1453 = shalt.err (!%p1450_p9)
}
0x1626   :  { %1076 = dma.vmem_to_hbm [thread:$0]  %s1687_s29, 128, %s1741_s6, [#allocation8]  }
0x1627   :  { %1454 = dma.done.wait [#allocation6], 1024  }
0x1628   :  { %1455 = vsyncadd [#allocation6], 4294966272 }
0x1629   :  { %1456 = dma.done.wait [#allocation8], 256  }
0x162a   :  { %1457 = vsyncadd [#allocation8], 4294967040 }
0x162b   :  { %1086 = vsyncpa [#allocation6], 1 }
0x162c   :  { %1087 = vsyncpa [#allocation8], 1 }

</bundles_post_ra>
